<compile_context>
chip_gen: v5e
topology: v5e:2x2
jax: 0.10.0
libtpu: 0.0.40
codegen_flags: <defaults>
</compile_context>

<pallas_src>
import math

import jax
import jax.numpy as jnp
from jax.experimental import pallas as pl
from jax.experimental.pallas import tpu as pltpu


def _copy_kernel(x_ref, o_ref):
    # Pure element copy of the current tile (VMEM -> VMEM).
    o_ref[...] = x_ref[...]


def _resolve_shape(shape, numel):
    """Resolve a possible -1 entry, mimicking torch reshape semantics."""
    shape = tuple(int(s) for s in shape)
    if -1 in shape:
        idx = shape.index(-1)
        known = math.prod(s for s in shape if s != -1)
        assert known > 0 and numel % known == 0, "cannot infer -1 dimension"
        shape = shape[:idx] + (numel // known,) + shape[idx + 1:]
    assert math.prod(shape) == numel, "reshape size mismatch"
    return shape


# Dtype-packing-aware sublane multiples: bf16 packs 2 rows / int8 packs 4 rows
# per vreg sublane, so row blocks should be multiples of 16 / 32 respectively.
_SUBLANES = {4: 8, 2: 16, 1: 32}

# ~2 MiB per block: with double-buffered input + output that is <= 8 MiB of
# VMEM, comfortably inside v7x's 32 MiB scoped budget (64 MiB physical) and
# the raised v5e/v6e limits below, while easily amortizing the ~0.35 us
# per-grid-step overhead.
_BLOCK_BYTES = 2 << 20


def _plan_tiling(numel, itemsize):
    """Pick a lane-dense 2D view (rows, W) and a row-block size for the copy."""
    for W in (8192, 4096, 2048, 1024, 512, 256, 128):  # widest lane-dense slab
        if numel % W == 0:
            break
    else:
        return None  # element count not a multiple of 128 -> fallback path
    rows = numel // W
    sub = _SUBLANES.get(itemsize, 8)
    budget_rows = max(sub, (_BLOCK_BYTES // (W * itemsize)) // sub * sub)
    blk = None
    if rows % sub == 0:
        start = min(budget_rows, rows)  # both are multiples of sub here
        for cand in range(start, 0, -sub):
            if rows % cand == 0:
                blk = cand
                break
    if blk is None:
        blk = rows  # full extent along the row axis is always a legal block dim
    return W, rows, blk


def _pallas_copy_flat(x):
    """Identity copy of x's flattened buffer through a Pallas kernel.

    The output aliases the input buffer (input_output_aliases={0: 0}); since
    the values written are identical to the values read, this is safe whether
    or not XLA actually reuses the buffer.
    """
    numel = x.size
    itemsize = jnp.dtype(x.dtype).itemsize
    cost = pl.CostEstimate(flops=0, transcendentals=0,
                           bytes_accessed=2 * numel * itemsize)

    plan = _plan_tiling(numel, itemsize)
    if plan is not None:
        W, rows, blk = plan
        x2d = x.reshape(rows, W)
        out2d = pl.pallas_call(
            _copy_kernel,
            out_shape=jax.ShapeDtypeStruct((rows, W), x.dtype),
            grid=(rows // blk,),
            in_specs=[pl.BlockSpec((blk, W), lambda i: (i, 0))],
            out_specs=pl.BlockSpec((blk, W), lambda i: (i, 0)),
            input_output_aliases={0: 0},
            cost_estimate=cost,
            compiler_params=pltpu.CompilerParams(
                # parallel row axis: shards across v7x's 2 TensorCores,
                # harmless on single-TC v5e/v6e.
                dimension_semantics=("parallel",),
                # raise scoped VMEM (v5e default is only 16 MiB) so the
                # MiB-scale double-buffered blocks always fit.
                vmem_limit_bytes=64 << 20,
            ),
        )(x2d)
        return out2d.reshape(-1)

    # Element count not a multiple of 128: single full-array block.  Only
    # expected for small, ragged tensors in this module's usage.
    # TODO(synk): pad+tile this path if huge non-128-divisible tensors appear.
    x2d = x.reshape(1, numel)
    out2d = pl.pallas_call(
        _copy_kernel,
        out_shape=jax.ShapeDtypeStruct((1, numel), x.dtype),
        in_specs=[pl.BlockSpec((1, numel), lambda: (0, 0))],
        out_specs=pl.BlockSpec((1, numel), lambda: (0, 0)),
        input_output_aliases={0: 0},
        cost_estimate=cost,
        compiler_params=pltpu.CompilerParams(vmem_limit_bytes=64 << 20),
    )(x2d)
    return out2d.reshape(-1)


class Resize:
    """JAX/Pallas equivalent of the PyTorch Resize module."""

    def __init__(self, *args):
        self.shape = args

    def __call__(self, x):
        target = _resolve_shape(self.shape, x.size)
        # Data path: aliased identity copy through Pallas (near-zero HBM cost),
        # then a metadata-only reshape to the requested target shape.
        flat = _pallas_copy_flat(x)
        return flat.reshape(target)


if __name__ == "__main__":
    key = jax.random.PRNGKey(0)
    # Small NCHW-style input consistent with a DQN conv feature map.
    x = jax.random.normal(key, (2, 4, 16, 16), dtype=jnp.float32)

    # Resize(2, -1): flatten everything after the batch dim, like the typical
    # usage of this module before a Linear layer.
    resize = Resize(2, -1)
    y = resize(x)
    jax.block_until_ready(y)

    # Correctness check against plain JAX reshape (== torch reshape semantics).
    ref = x.reshape(2, -1)
    assert y.shape == (2, 4 * 16 * 16), y.shape
    assert y.dtype == x.dtype
    assert bool(jnp.array_equal(y, ref))

    print("KERNEL_OK")
</pallas_src>

<mosaic_0001>
module attributes {stable_mosaic.version = 11 : i64} {
  func.func @_copy_kernel(%arg0: i32, %arg1: memref<1x2048xf32, #tpu.memory_space<vmem>>, %arg2: memref<1x2048xf32, #tpu.memory_space<vmem>>) attributes {dimension_semantics = [#tpu.dimension_semantics<parallel>], iteration_bounds = array<i64: 1>, scalar_prefetch = 0 : i64, scratch_operands = 0 : i64, tpu.core_type = #tpu.core_type<tc>, window_params = [{transform_indices = @transform_0, window_bounds = array<i64: 1, 2048>}, {transform_indices = @transform_1, window_bounds = array<i64: 1, 2048>}]} {
    %c0 = arith.constant 0 : index
    %c0_0 = arith.constant 0 : index
    %0 = vector.load %arg1[%c0, %c0_0] : memref<1x2048xf32, #tpu.memory_space<vmem>>, vector<1x2048xf32>
    %c0_1 = arith.constant 0 : index
    %c0_2 = arith.constant 0 : index
    %1 = vector.load %arg2[%c0_1, %c0_2] : memref<1x2048xf32, #tpu.memory_space<vmem>>, vector<1x2048xf32>
    tpu.vector_store %arg2[%c0_1, %c0_2], %0 {strides = array<i32>} : memref<1x2048xf32, #tpu.memory_space<vmem>>, vector<1x2048xf32>,
    return
  }
  func.func @transform_0(%arg0: i32) -> (i32, i32) {
    %c0_i32 = arith.constant 0 : i32
    %c0_i32_0 = arith.constant 0 : i32
    return %arg0, %c0_i32 : i32, i32
  }
  func.func @transform_1(%arg0: i32) -> (i32, i32) {
    %c0_i32 = arith.constant 0 : i32
    %c0_i32_0 = arith.constant 0 : i32
    return %arg0, %c0_i32 : i32, i32
  }
}

</mosaic_0001>

<bundles_post_ra>
// kernel: tpu_custom_call.1
= control target key start
LH: loop header
LB: loop body
LE: loop exit
PB: predicated region body
PF: predicated region fallthrough
CT: control target
= control target key end

     0   :  { %6 = vsyncpa [#allocation3], 0  ;;  %s116_s0 = inlined_call_operand.hbm [shape: f32[1,2048], index: 0, kind: input, shape index: {}, may-alias: {0,1}]   ;;  %s117_s1 = inlined_call_operand.hbm [shape: f32[1,2048], index: 1, kind: output, shape index: {}, may-alias: {0,1}]  }
   0x1   :  { %7 = vsyncpa [#allocation4], 0  ;;  %s13_s8 = sshll.u32 %s116_s0, 4  ;;  %s98_s9 = smov [#allocation2]   ;;  %s14_s8 = int_to_ptr.hbm [resolvable:$true] %s13_s8 }
   0x2   :  { %s15_s10 = sshll.u32 %s98_s9, 4  ;;  %s16_s10 = int_to_ptr.vmem [resolvable:$true] %s15_s10 }
   0x3   :  { %18 = dma.hbm_to_vmem [thread:$0]  %s14_s8, 256, %s16_s10, [#allocation3]  }
   0x4   :  { %94 = dma.done.wait [#allocation3], 256  }
   0x5   :  { %95 = vsyncadd [#allocation3], 4294967040  ;;  %s99_s11 = smov [#allocation5]   ;;  %s34_s15 = sshll.u32 %s117_s1, 4  ;;  %v23_v0 = vld [vmem:[#allocation2] sm:$0xff]  ;;  %v24_v1 = vld [vmem:[#allocation2 + $0x8] sm:$0xff]  ;;  %s35_s15 = int_to_ptr.hbm [resolvable:$true] %s34_s15 }
   0x6   :  { %s32_s12 = sshll.u32 %s99_s11, 4  ;;  %25 = vst [vmem:[#allocation5] sm:$0xff] %v23_v0  ;;  %s33_s12 = int_to_ptr.vmem [resolvable:$true] %s32_s12 }
   0x7   :  { %26 = vst [vmem:[#allocation5 + $0x8] sm:$0xff] %v24_v1 }
   0x8   :  { %37 = dma.vmem_to_hbm [thread:$0]  %s33_s12, 256, %s35_s15, [#allocation4]  }
   0x9   :  { %96 = dma.done.wait [#allocation4], 256  }
   0xa   :  { %97 = vsyncadd [#allocation4], 4294967040 }
   0xb   :  { %42 = vsyncpa [#allocation3], 1 }
   0xc   :  { %43 = vsyncpa [#allocation4], 1 }

</bundles_post_ra>
